<compile_context>
chip_gen: v7x
topology: tpu7x:2x2x1
jax: 0.10.0
libtpu: 0.0.40
codegen_flags: <defaults>
</compile_context>

<pallas_src>
import jax
import jax.numpy as jnp
from jax.experimental import pallas as pl
from jax.experimental.pallas import tpu as pltpu

EPS = 1e-5  # nn.LayerNorm default
VMEM_LIMIT_BYTES = 32 * 1024 * 1024  # safe scoped-VMEM ceiling on v5e/v6e/v7x


def _patch_merge_kernel(x_ref, w_ref, c_ref, o_ref):
    # x_ref: (tm, 2, W2, 2C)   raw input rows; dim 1 is dh (row parity),
    #                          lanes hold (dw, c) pairs, dw-major.
    # w_ref: (4C, C)           gamma-folded projection weight, rows permuted to
    #                          the kernel's natural (dh, dw, c) order.
    # c_ref: (2, C)            row 0: column-sum of w_ref (for the -mean term),
    #                          row 1: beta @ W^T (folded LayerNorm bias).
    # o_ref: (tm, W2, C)
    tm, _, w2, two_c = x_ref.shape
    c_out = o_ref.shape[-1]
    rows = tm * w2

    blk = x_ref[...].astype(jnp.float32)              # (tm, 2, W2, 2C)
    x0 = blk[:, 0, :, :].reshape(rows, two_c)          # dh = 0 half (2C channels)
    x1 = blk[:, 1, :, :].reshape(rows, two_c)          # dh = 1 half (2C channels)

    # Single-pass LayerNorm statistics over all 4C contributing channels.
    s1 = jnp.sum(x0, axis=-1, keepdims=True) + jnp.sum(x1, axis=-1, keepdims=True)
    s2 = (jnp.sum(x0 * x0, axis=-1, keepdims=True)
          + jnp.sum(x1 * x1, axis=-1, keepdims=True))
    inv_n = 1.0 / (2.0 * two_c)                        # 1 / (4C)
    mean = s1 * inv_n
    var = s2 * inv_n - mean * mean
    inv_std = jax.lax.rsqrt(var + EPS)

    # Project the raw rows on the MXU; the per-row normalization is a scalar
    # affine per row and commutes out of the contraction, so it is applied on
    # the (rows, C) result instead of the (rows, 4C) operand.
    w = w_ref[...].astype(jnp.float32)
    acc = jnp.dot(x0, w[:two_c, :], preferred_element_type=jnp.float32)
    acc = acc + jnp.dot(x1, w[two_c:, :], preferred_element_type=jnp.float32)

    gsum = c_ref[0:1, :].astype(jnp.float32)           # (1, C) = ones(4C) @ (gamma*W^T)
    bias = c_ref[1:2, :].astype(jnp.float32)           # (1, C) = beta @ W^T
    y = inv_std * (acc - mean * gsum) + bias
    o_ref[...] = y.reshape(tm, w2, c_out).astype(o_ref.dtype)


def _choose_tm(M, W2, C, itemsize, vmem_limit_bytes):
    """Largest row-group tile that keeps pipeline buffers + working set in VMEM."""
    in_bytes = 4 * C * W2 * itemsize                   # one m-row of input  (2, W2, 2C)
    out_bytes = C * W2 * itemsize                      # one m-row of output (W2, C)
    # f32 working set per m-row inside the kernel body: blk copy (4C*W2) +
    # x0/x1 views (4C*W2) + matmul result / normalized y (2*C*W2).
    work_bytes = (4 * C + 4 * C + 2 * C) * W2 * 4
    per_m = 2 * (in_bytes + out_bytes) + work_bytes    # 2x: double-buffered pipeline
    fixed = 2 * (4 * C * C + 2 * C) * 4                # resident weight + consts (x2 slack)
    budget = max(vmem_limit_bytes - fixed - (4 << 20), 1 << 20)
    tm = max(1, budget // per_m)
    if tm >= 8:
        tm -= tm % 8                                   # keep rows = tm*W2 sublane-friendly
    return int(max(1, min(tm, M)))


def patch_merging(x, gamma, beta, w_red, *, vmem_limit_bytes=VMEM_LIMIT_BYTES):
    """PatchMerging forward.

    x:      (B, H, W, C)
    gamma:  (4C,)   LayerNorm weight
    beta:   (4C,)   LayerNorm bias
    w_red:  (C, 4C) Linear weight (PyTorch layout: out_features x in_features)
    returns (B, H//2, W//2, C)
    """
    B, H, W, C = x.shape
    assert H % 2 == 0 and W % 2 == 0, f"x size ({H}*{W}) are not even."
    H2, W2 = H // 2, W // 2
    M = B * H2

    # Metadata-only reshape: (B, H, W, C) -> (B*H/2, 2, W/2, 2C).  The 2x2
    # spatial gather happens inside the kernel, directly out of this view.
    xr = x.reshape(M, 2, W2, 2 * C)

    # Fold the LayerNorm affine into the projection and permute the weight rows
    # from the PyTorch concat order [x0,x1,x2,x3] = [(dh,dw)=(0,0),(1,0),(0,1),(1,1)]
    # (dw-major) to the kernel's natural (dh-major, dw, c) memory order so no
    # in-kernel channel concat/shuffle is needed.
    w_t = w_red.T.astype(jnp.float32)                          # (4C, C): y = x @ W^T
    wg = gamma.astype(jnp.float32)[:, None] * w_t              # (4C, C)
    w_nat = wg.reshape(2, 2, C, C).transpose(1, 0, 2, 3).reshape(4 * C, C)
    gsum = jnp.sum(wg, axis=0, keepdims=True)                  # (1, C)
    bias = (beta.astype(jnp.float32) @ w_t)[None, :]           # (1, C)
    consts = jnp.concatenate([gsum, bias], axis=0)             # (2, C)

    tm = _choose_tm(M, W2, C, jnp.dtype(x.dtype).itemsize, vmem_limit_bytes)
    grid = (pl.cdiv(M, tm),)

    out = pl.pallas_call(
        _patch_merge_kernel,
        out_shape=jax.ShapeDtypeStruct((M, W2, C), x.dtype),
        grid_spec=pltpu.PrefetchScalarGridSpec(
            num_scalar_prefetch=0,
            grid=grid,
            in_specs=[
                pl.BlockSpec((tm, 2, W2, 2 * C), lambda i: (i, 0, 0, 0)),
                pl.BlockSpec((4 * C, C), lambda i: (0, 0)),      # resident weight
                pl.BlockSpec((2, C), lambda i: (0, 0)),          # resident consts
            ],
            out_specs=pl.BlockSpec((tm, W2, C), lambda i: (i, 0, 0)),
        ),
        compiler_params=pltpu.CompilerParams(
            dimension_semantics=("parallel",),
            vmem_limit_bytes=vmem_limit_bytes,
        ),
    )(xr, w_nat, consts)

    return out.reshape(B, H2, W2, C)


if __name__ == "__main__":
    key = jax.random.PRNGKey(0)
    kx, kg, kb, kw = jax.random.split(key, 4)

    B, H, W, C = 2, 16, 16, 4
    x = jax.random.normal(kx, (B, H, W, C), dtype=jnp.float32)

    # deterministic synthetic parameters (shapes per PatchMerging.__init__)
    gamma = 1.0 + 0.1 * jax.random.normal(kg, (4 * C,), dtype=jnp.float32)
    beta = 0.1 * jax.random.normal(kb, (4 * C,), dtype=jnp.float32)
    w_red = jax.random.normal(kw, (C, 4 * C), dtype=jnp.float32) * (1.0 / (4 * C) ** 0.5)

    y = patch_merging(x, gamma, beta, w_red)
    jax.block_until_ready(y)

    # reference check in plain JAX (mirrors the PyTorch forward)
    x0 = x[:, 0::2, 0::2, :]
    x1 = x[:, 1::2, 0::2, :]
    x2 = x[:, 0::2, 1::2, :]
    x3 = x[:, 1::2, 1::2, :]
    xcat = jnp.concatenate([x0, x1, x2, x3], -1).reshape(B, -1, 4 * C)
    mu = xcat.mean(-1, keepdims=True)
    var = ((xcat - mu) ** 2).mean(-1, keepdims=True)
    xn = (xcat - mu) / jnp.sqrt(var + EPS) * gamma + beta
    ref = (xn @ w_red.T).reshape(B, H // 2, W // 2, C)

    assert y.shape == (B, H // 2, W // 2, C)
    assert jnp.allclose(y, ref, atol=1e-4, rtol=1e-4)
    print("KERNEL_OK")
</pallas_src>

<mosaic_0001>
module attributes {stable_mosaic.version = 11 : i64} {
  func.func @_patch_merge_kernel(%arg0: i32, %arg1: memref<16x2x8x8xf32, #tpu.memory_space<vmem>>, %arg2: memref<16x4xf32, #tpu.memory_space<vmem>>, %arg3: memref<2x4xf32, #tpu.memory_space<vmem>>, %arg4: memref<16x8x4xf32, #tpu.memory_space<vmem>>) attributes {dimension_semantics = [#tpu.dimension_semantics<parallel>], iteration_bounds = array<i64: 1>, scalar_prefetch = 0 : i64, scratch_operands = 0 : i64, tpu.core_type = #tpu.core_type<tc>, window_params = [{transform_indices = @transform_0, window_bounds = array<i64: 16, 2, 8, 8>}, {pipeline_mode = #tpu.pipeline_mode<synchronous>, transform_indices = @transform_1, window_bounds = array<i64: 16, 4>}, {pipeline_mode = #tpu.pipeline_mode<synchronous>, transform_indices = @transform_2, window_bounds = array<i64: 2, 4>}, {transform_indices = @transform_3, window_bounds = array<i64: 16, 8, 4>}]} {
    %c0 = arith.constant 0 : index
    %c0_0 = arith.constant 0 : index
    %c0_1 = arith.constant 0 : index
    %c0_2 = arith.constant 0 : index
    %0 = vector.load %arg1[%c0, %c0_0, %c0_1, %c0_2] : memref<16x2x8x8xf32, #tpu.memory_space<vmem>>, vector<16x2x8x8xf32>
    %1 = vector.extract_strided_slice %0 {offsets = [0, 0, 0, 0], sizes = [16, 1, 8, 8], strides = [1, 1, 1, 1]} : vector<16x2x8x8xf32> to vector<16x1x8x8xf32>
    %2 = vector.shape_cast %1 : vector<16x1x8x8xf32> to vector<16x8x8xf32>
    %3 = vector.shape_cast %2 : vector<16x8x8xf32> to vector<128x8xf32>
    %4 = vector.extract_strided_slice %0 {offsets = [0, 1, 0, 0], sizes = [16, 1, 8, 8], strides = [1, 1, 1, 1]} : vector<16x2x8x8xf32> to vector<16x1x8x8xf32>
    %5 = vector.shape_cast %4 : vector<16x1x8x8xf32> to vector<16x8x8xf32>
    %6 = vector.shape_cast %5 : vector<16x8x8xf32> to vector<128x8xf32>
    %cst = arith.constant dense<0.000000e+00> : vector<128xf32>
    %7 = vector.multi_reduction <add>, %3, %cst [1] : vector<128x8xf32> to vector<128xf32>
    %8 = vector.shape_cast %7 : vector<128xf32> to vector<128x1xf32>
    %cst_3 = arith.constant dense<0.000000e+00> : vector<128xf32>
    %9 = vector.multi_reduction <add>, %6, %cst_3 [1] : vector<128x8xf32> to vector<128xf32>
    %10 = vector.shape_cast %9 : vector<128xf32> to vector<128x1xf32>
    %11 = arith.addf %8, %10 : vector<128x1xf32>
    %12 = arith.mulf %3, %3 : vector<128x8xf32>
    %cst_4 = arith.constant dense<0.000000e+00> : vector<128xf32>
    %13 = vector.multi_reduction <add>, %12, %cst_4 [1] : vector<128x8xf32> to vector<128xf32>
    %14 = vector.shape_cast %13 : vector<128xf32> to vector<128x1xf32>
    %15 = arith.mulf %6, %6 : vector<128x8xf32>
    %cst_5 = arith.constant dense<0.000000e+00> : vector<128xf32>
    %16 = vector.multi_reduction <add>, %15, %cst_5 [1] : vector<128x8xf32> to vector<128xf32>
    %17 = vector.shape_cast %16 : vector<128xf32> to vector<128x1xf32>
    %18 = arith.addf %14, %17 : vector<128x1xf32>
    %cst_6 = arith.constant 6.250000e-02 : f32
    %19 = vector.broadcast %cst_6 : f32 to vector<128x1xf32>
    %20 = arith.mulf %11, %19 : vector<128x1xf32>
    %cst_7 = arith.constant 6.250000e-02 : f32
    %21 = vector.broadcast %cst_7 : f32 to vector<128x1xf32>
    %22 = arith.mulf %18, %21 : vector<128x1xf32>
    %23 = arith.mulf %20, %20 : vector<128x1xf32>
    %24 = arith.subf %22, %23 : vector<128x1xf32>
    %cst_8 = arith.constant 9.99999974E-6 : f32
    %25 = vector.broadcast %cst_8 : f32 to vector<128x1xf32>
    %26 = arith.addf %24, %25 : vector<128x1xf32>
    %27 = math.rsqrt %26 : vector<128x1xf32>
    %c0_9 = arith.constant 0 : index
    %c0_10 = arith.constant 0 : index
    %28 = vector.load %arg2[%c0_9, %c0_10] : memref<16x4xf32, #tpu.memory_space<vmem>>, vector<16x4xf32>
    %29 = vector.extract_strided_slice %28 {offsets = [0, 0], sizes = [8, 4], strides = [1, 1]} : vector<16x4xf32> to vector<8x4xf32>
    %cst_11 = arith.constant dense<0.000000e+00> : vector<128x4xf32>
    %30 = tpu.matmul %3, %29, %cst_11 {dimension_numbers = #tpu.dot_dimension_numbers<[1], [0], [0], [1], [0, 0, 1, 1], [], []>} : vector<128x8xf32>, vector<8x4xf32>, vector<128x4xf32> -> vector<128x4xf32>
    %31 = vector.extract_strided_slice %28 {offsets = [8, 0], sizes = [8, 4], strides = [1, 1]} : vector<16x4xf32> to vector<8x4xf32>
    %cst_12 = arith.constant dense<0.000000e+00> : vector<128x4xf32>
    %32 = tpu.matmul %6, %31, %cst_12 {dimension_numbers = #tpu.dot_dimension_numbers<[1], [0], [0], [1], [0, 0, 1, 1], [], []>} : vector<128x8xf32>, vector<8x4xf32>, vector<128x4xf32> -> vector<128x4xf32>
    %33 = arith.addf %30, %32 : vector<128x4xf32>
    %c0_13 = arith.constant 0 : index
    %c0_14 = arith.constant 0 : index
    %34 = vector.load %arg3[%c0_13, %c0_14] : memref<2x4xf32, #tpu.memory_space<vmem>>, vector<1x4xf32>
    %c1 = arith.constant 1 : index
    %c0_15 = arith.constant 0 : index
    %35 = vector.load %arg3[%c1, %c0_15] : memref<2x4xf32, #tpu.memory_space<vmem>>, vector<1x4xf32>
    %36 = vector.broadcast %20 : vector<128x1xf32> to vector<128x4xf32>
    %37 = vector.broadcast %34 : vector<1x4xf32> to vector<128x4xf32>
    %38 = arith.mulf %36, %37 : vector<128x4xf32>
    %39 = arith.subf %33, %38 : vector<128x4xf32>
    %40 = vector.broadcast %27 : vector<128x1xf32> to vector<128x4xf32>
    %41 = arith.mulf %40, %39 : vector<128x4xf32>
    %42 = vector.broadcast %35 : vector<1x4xf32> to vector<128x4xf32>
    %43 = arith.addf %41, %42 : vector<128x4xf32>
    %44 = vector.shape_cast %43 : vector<128x4xf32> to vector<16x8x4xf32>
    %c0_16 = arith.constant 0 : index
    %c0_17 = arith.constant 0 : index
    %c0_18 = arith.constant 0 : index
    %45 = vector.load %arg4[%c0_16, %c0_17, %c0_18] : memref<16x8x4xf32, #tpu.memory_space<vmem>>, vector<16x8x4xf32>
    tpu.vector_store %arg4[%c0_16, %c0_17, %c0_18], %44 {strides = array<i32>} : memref<16x8x4xf32, #tpu.memory_space<vmem>>, vector<16x8x4xf32>,
    return
  }
  func.func @transform_0(%arg0: i32) -> (i32, i32, i32, i32) {
    %c0_i32 = arith.constant 0 : i32
    %c0_i32_0 = arith.constant 0 : i32
    %c0_i32_1 = arith.constant 0 : i32
    %c0_i32_2 = arith.constant 0 : i32
    return %arg0, %c0_i32, %c0_i32_0, %c0_i32_1 : i32, i32, i32, i32
  }
  func.func @transform_1(%arg0: i32) -> (i32, i32) {
    %c0_i32 = arith.constant 0 : i32
    %c0_i32_0 = arith.constant 0 : i32
    %c0_i32_1 = arith.constant 0 : i32
    return %c0_i32, %c0_i32_0 : i32, i32
  }
  func.func @transform_2(%arg0: i32) -> (i32, i32) {
    %c0_i32 = arith.constant 0 : i32
    %c0_i32_0 = arith.constant 0 : i32
    %c0_i32_1 = arith.constant 0 : i32
    return %c0_i32, %c0_i32_0 : i32, i32
  }
  func.func @transform_3(%arg0: i32) -> (i32, i32, i32) {
    %c0_i32 = arith.constant 0 : i32
    %c0_i32_0 = arith.constant 0 : i32
    %c0_i32_1 = arith.constant 0 : i32
    return %arg0, %c0_i32, %c0_i32_0 : i32, i32, i32
  }
}

</mosaic_0001>

<bundles_post_ra>
// kernel: tpu_custom_call.1
= control target key start
LH: loop header
LB: loop body
LE: loop exit
PB: predicated region body
PF: predicated region fallthrough
CT: control target
= control target key end

     0   :  { %vm46_vm0 = vcmask 64512   ;;  %vm861_vm1 = vcmask 31744   ;;  %s1928_s1 = inlined_call_operand.vmem [shape: f32[16,4], index: 1, kind: input, shape index: {}]   ;;  %s1929_s0 = inlined_call_operand.vmem [shape: f32[16,2,8,8], index: 0, kind: input, shape index: {}]   ;;  %s1930_s2 = inlined_call_operand.vmem [shape: f32[2,4], index: 2, kind: input, shape index: {}]   ;;  %s1931_s3 = inlined_call_operand.vmem [shape: f32[16,8,4], index: 3, kind: output, shape index: {}]  }
   0x1   :  { %v400_v0 = vld [vmem:[%s1928_s1 + $0x8] sm:$0xff]  ;;  %v399_v1 = vld [vmem:[%s1928_s1] sm:$0xff]  ;;  %v1095_v7 = vld [vmem:[%s1929_s0 + $0x18] sm:$0xff] }
   0x2   :  { %v18_v2 = vld [vmem:[%s1929_s0 + $0x20] sm:$0xff]  ;;  %950 = vmatprep.subr.mxu1 %v400_v0  ;;  %976 = vmatprep.subr.mxu0 %v399_v1  ;;  %v1083_v4 = vld [vmem:[%s1929_s0 + $0x8] sm:$0xff]  ;;  %v1100_v8 = vld [vmem:[%s1929_s0 + $0x10] sm:$0xff]  ;;  %v224_v34 = vmul.f32 %v1095_v7, %v1095_v7 }
   0x3   :  { %v53_v3 = vsel %vm46_vm0, %v18_v2, 0.0  ;;  %v1088_v5 = vld [vmem:[%s1929_s0] sm:$0xff]  ;;  %951 = vmatpush3.msra.mxu1 %v400_v0  ;;  %977 = vmatpush3.msra.mxu0 %v399_v1  ;;  %v1105_v9 = vld [vmem:[%s1929_s0 + $0x30] sm:$0xff]  ;;  %v1112_v10 = vld [vmem:[%s1929_s0 + $0x28] sm:$0xff]  ;;  %v50_v12 = vsel %vm46_vm0, %v1100_v8, 0.0  ;;  %v161_v18 = vmul.f32 %v18_v2, %v18_v2  ;;  %v223_v35 = vmul.f32 %v1083_v4, %v1083_v4 }
   0x4   :  { %v47_v6 = vsel %vm46_vm0, %v1088_v5, 0.0  ;;  %54 = vadd.xlane.f32.xlu1 %v53_v3  ;;  %952 = vmatprep.mubr.msk.f32.mxu1 %vm46_vm0, %v1083_v4  ;;  %v56_v11 = vsel %vm46_vm0, %v1105_v9, 0.0  ;;  %v1127_v13 = vld [vmem:[%s1929_s0 + $0x50] sm:$0xff]  ;;  %v1135_v14 = vld [vmem:[%s1929_s0 + $0x38] sm:$0xff]  ;;  %v1140_v15 = vld [vmem:[%s1929_s0 + $0x40] sm:$0xff]  ;;  %v1250_v40 = vsel %vm46_vm0, %v224_v34, 0.0  ;;  %v225_v43 = vmul.f32 %v1112_v10, %v1112_v10 }
   0x5   :  { %978 = vmatprep.mubr.msk.f32.mxu0 %vm46_vm0, %v1088_v5  ;;  %48 = vadd.xlane.f32.xlu0 %v47_v6  ;;  %v1145_v16 = vld [vmem:[%s1929_s0 + $0x48] sm:$0xff]  ;;  %v62_v17 = vsel %vm46_vm0, %v1127_v13, 0.0  ;;  %v59_v19 = vsel %vm46_vm0, %v1140_v15, 0.0  ;;  %v1158_v20 = vld [vmem:[%s1929_s0 + $0x70] sm:$0xff]  ;;  %v1167_v21 = vld [vmem:[%s1929_s0 + $0x58] sm:$0xff]  ;;  %v1182_v25 = vsel %vm46_vm0, %v161_v18, 0.0  ;;  %v226_v42 = vmul.f32 %v1135_v14, %v1135_v14 }
   0x6   :  { %953 = vmatmul.mubr.msk.f32.vlgmr.msra.gmra.mrb[0].mxu1 %vm46_vm0, %v1095_v7  ;;  %979 = vmatmul.mubr.msk.f32.vlgmr.msra.gmra.mrb[0].mxu0 %vm46_vm0, %v1100_v8  ;;  %v1172_v22 = vld [vmem:[%s1929_s0 + $0x60] sm:$0xff]  ;;  %v1177_v23 = vld [vmem:[%s1929_s0 + $0x68] sm:$0xff]  ;;  %v68_v24 = vsel %vm46_vm0, %v1158_v20, 0.0  ;;  %v1193_v27 = vld [vmem:[%s1929_s0 + $0x78] sm:$0xff]  ;;  %v1253_v41 = vsel %vm46_vm0, %v223_v35, 0.0  ;;  %v228_v45 = vmul.f32 %v1167_v21, %v1167_v21  ;;  %v227_v46 = vmul.f32 %v1145_v16, %v1145_v16 }
   0x7   :  { %955 = vmatprep.mubr.msk.f32.mxu1 %vm46_vm0, %v1112_v10  ;;  %981 = vmatprep.mubr.msk.f32.mxu0 %vm46_vm0, %v18_v2  ;;  %v65_v26 = vsel %vm46_vm0, %v1172_v22, 0.0  ;;  %v1198_v28 = vld [vmem:[%s1929_s0 + $0x90] sm:$0xff]  ;;  %v1207_v29 = vld [vmem:[%s1929_s0 + $0x80] sm:$0xff]  ;;  %v1222_v32 = vld [vmem:[%s1929_s0 + $0x88] sm:$0xff]  ;;  %v230_v47 = vmul.f32 %v1193_v27, %v1193_v27  ;;  %v229_v48 = vmul.f32 %v1177_v23, %v1177_v23  ;;  %v1283_v51 = vsel %vm46_vm0, %v226_v42, 0.0 }
   0x8   :  { %57 = vadd.xlane.f32.xlu1 %v56_v11  ;;  %v1212_v30 = vld [vmem:[%s1929_s0 + $0xb0] sm:$0xff]  ;;  %v1217_v31 = vld [vmem:[%s1929_s0 + $0xa0] sm:$0xff]  ;;  %v74_v33 = vsel %vm46_vm0, %v1198_v28, 0.0  ;;  %v71_v36 = vsel %vm46_vm0, %v1207_v29, 0.0  ;;  %v1247_v39 = vld [vmem:[%s1929_s0 + $0x98] sm:$0xff]  ;;  %v1286_v52 = vsel %vm46_vm0, %v225_v43, 0.0  ;;  %v231_v54 = vmul.f32 %v1222_v32, %v1222_v32 }
   0x9   :  { %51 = vadd.xlane.f32.xlu0 %v50_v12  ;;  %v80_v37 = vsel %vm46_vm0, %v1212_v30, 0.0  ;;  %v77_v38 = vsel %vm46_vm0, %v1217_v31, 0.0  ;;  %v1262_v44 = vld [vmem:[%s1929_s0 + $0xa8] sm:$0xff]  ;;  %v1275_v49 = vld [vmem:[%s1929_s0 + $0xb8] sm:$0xff]  ;;  %v1280_v50 = vld [vmem:[%s1929_s0 + $0xd0] sm:$0xff]  ;;  %v232_v53 = vmul.f32 %v1247_v39, %v1247_v39  ;;  %v1307_v57 = vsel %vm46_vm0, %v228_v45, 0.0 }
   0xa   :  { %956 = vmatmul.mubr.msk.f32.gmra.mrb[2].mxu1 %vm46_vm0, %v1135_v14  ;;  %982 = vmatmul.mubr.msk.f32.gmra.mrb[2].mxu0 %vm46_vm0, %v1105_v9  ;;  %v1299_v55 = vld [vmem:[%s1929_s0 + $0xc8] sm:$0xff]  ;;  %v1304_v56 = vld [vmem:[%s1929_s0 + $0xc0] sm:$0xff]  ;;  %v1310_v58 = vsel %vm46_vm0, %v227_v46, 0.0  ;;  %v1313_v59 = vsel %vm46_vm0, %v230_v47, 0.0  ;;  %v1316_v60 = vsel %vm46_vm0, %v229_v48, 0.0  ;;  %v1325_v61 = vld [vmem:[%s1929_s0 + $0xd8] sm:$0xff]  ;;  %v234_v2 = vmul.f32 %v1275_v49, %v1275_v49 }
   0xb   :  { %958 = vmatprep.mubr.msk.f32.mxu1 %vm46_vm0, %v1145_v16  ;;  %984 = vmatprep.mubr.msk.f32.mxu0 %vm46_vm0, %v1140_v15  ;;  %v1330_v62 = vld [vmem:[%s1929_s0 + $0xe8] sm:$0xff]  ;;  %v1335_v63 = vld [vmem:[%s1929_s0 + $0xf8] sm:$0xff]  ;;  %v1338_v0 = vsel %vm46_vm0, %v232_v53, 0.0  ;;  %v1341_v1 = vsel %vm46_vm0, %v231_v54, 0.0  ;;  %v233_v3 = vmul.f32 %v1262_v44, %v1262_v44  ;;  %v236_v6 = vmul.f32 %v1325_v61, %v1325_v61 }
   0xc   :  { %63 = vadd.xlane.f32.xlu1 %v62_v17  ;;  %v235_v11 = vmul.f32 %v1299_v55, %v1299_v55  ;;  %v238_v12 = vmul.f32 %v1335_v63, %v1335_v63  ;;  %v237_v17 = vmul.f32 %v1330_v62, %v1330_v62  ;;  %v86_v18 = vsel %vm46_vm0, %v1280_v50, 0.0 }
   0xd   :  { %60 = vadd.xlane.f32.xlu0 %v59_v19  ;;  %v83_v19 = vsel %vm46_vm0, %v1304_v56, 0.0  ;;  %v1375_v34 = vsel %vm46_vm0, %v236_v6, 0.0  ;;  %v98_v45 = vsel %vm46_vm0, %v1095_v7, 0.0  ;;  %v95_v46 = vsel %vm46_vm0, %v1083_v4, 0.0 }
   0xe   :  { %959 = vmatmul.mubr.msk.f32.gmra.mrb[4].mxu1 %vm46_vm0, %v1167_v21  ;;  %985 = vmatmul.mubr.msk.f32.gmra.mrb[4].mxu0 %vm46_vm0, %v1127_v13  ;;  %v1378_v35 = vsel %vm46_vm0, %v235_v11, 0.0  ;;  %v104_v47 = vsel %vm46_vm0, %v1135_v14, 0.0  ;;  %v101_v48 = vsel %vm46_vm0, %v1112_v10, 0.0  ;;  %v110_v7 = vsel %vm46_vm0, %v1167_v21, 0.0 }
   0xf   :  { %961 = vmatprep.mubr.msk.f32.mxu1 %vm46_vm0, %v1177_v23  ;;  %987 = vmatprep.mubr.msk.f32.mxu0 %vm46_vm0, %v1172_v22  ;;  %v107_v53 = vsel %vm46_vm0, %v1145_v16, 0.0  ;;  %v116_v4 = vsel %vm46_vm0, %v1193_v27, 0.0  ;;  %v113_v54 = vsel %vm46_vm0, %v1177_v23, 0.0  ;;  %v122_v10 = vsel %vm46_vm0, %v1247_v39, 0.0 }
  0x10   :  { %69 = vadd.xlane.f32.xlu1 %v68_v24  ;;  %v1360_v24 = vsel %vm46_vm0, %v234_v2, 0.0  ;;  %v119_v14 = vsel %vm46_vm0, %v1222_v32, 0.0  ;;  %v128_v16 = vsel %vm46_vm0, %v1275_v49, 0.0  ;;  %v125_v21 = vsel %vm46_vm0, %v1262_v44, 0.0 }
  0x11   :  { %66 = vadd.xlane.f32.xlu0 %v65_v26  ;;  %v1363_v26 = vsel %vm46_vm0, %v233_v3, 0.0  ;;  %v134_v23 = vsel %vm46_vm0, %v1325_v61, 0.0  ;;  %v165_v6 = vmul.f32 %v1172_v22, %v1172_v22 }
  0x12   :  { %962 = vmatmul.mubr.msk.f32.gmra.mrb[6].mxu1 %vm46_vm0, %v1193_v27  ;;  %988 = vmatmul.mubr.msk.f32.gmra.mrb[6].mxu0 %vm46_vm0, %v1158_v20  ;;  %v131_v27 = vsel %vm46_vm0, %v1299_v55, 0.0 }
  0x13   :  { %964 = vmatprep.mubr.msk.f32.mxu1 %vm46_vm0, %v1222_v32  ;;  %990 = vmatprep.mubr.msk.f32.mxu0 %vm46_vm0, %v1207_v29  ;;  %v140_v32 = vsel %vm46_vm0, %v1335_v63, 0.0  ;;  %v193_v11 = vsel %vm46_vm0, %v165_v6, 0.0 }
  0x14   :  { %75 = vadd.xlane.f32.xlu1 %v74_v33  ;;  %v1372_v33 = vld [vmem:[%s1929_s0 + $0xf0] sm:$0xff] }
  0x15   :  { %72 = vadd.xlane.f32.xlu0 %v71_v36  ;;  %v1381_v36 = vsel %vm46_vm0, %v238_v12, 0.0  ;;  %v92_v42 = vsel %vm46_vm0, %v1372_v33, 0.0  ;;  %v170_v12 = vmul.f32 %v1212_v30, %v1212_v30 }
  0x16   :  { %965 = vmatmul.mubr.msk.f32.gmra.mrb[8].mxu1 %vm46_vm0, %v1247_v39  ;;  %991 = vmatmul.mubr.msk.f32.gmra.mrb[8].mxu0 %vm46_vm0, %v1198_v28  ;;  %v160_v39 = vmul.f32 %v1100_v8, %v1100_v8  ;;  %v164_v8 = vmul.f32 %v1127_v13, %v1127_v13 }
  0x17   :  { %967 = vmatprep.mubr.msk.f32.mxu1 %vm46_vm0, %v1262_v44  ;;  %993 = vmatprep.mubr.msk.f32.mxu0 %vm46_vm0, %v1217_v31  ;;  %v159_v44 = vmul.f32 %v1088_v5, %v1088_v5 }
  0x18   :  { %81 = vadd.xlane.f32.xlu1 %v80_v37  ;;  %v1384_v37 = vsel %vm46_vm0, %v237_v17, 0.0  ;;  %v190_v5 = vsel %vm46_vm0, %v164_v8, 0.0  ;;  %v169_v17 = vmul.f32 %v1217_v31, %v1217_v31  ;;  %v1548_v8 = vld [vmem:[%s1930_s2] ss:$0 sm:$0xff] }
  0x19   :  { %78 = vadd.xlane.f32.xlu0 %v77_v38  ;;  %v1393_v38 = vld [vmem:[%s1929_s0 + $0xe0] sm:$0xff]  ;;  %v175_v2 = vsel %vm46_vm0, %v159_v44, 0.0 }
  0x1a   :  { %968 = vmatmul.mubr.msk.f32.gmra.mrb[10].mxu1 %vm46_vm0, %v1275_v49  ;;  %994 = vmatmul.mubr.msk.f32.gmra.mrb[10].mxu0 %vm46_vm0, %v1212_v30  ;;  %v89_v43 = vsel %vm46_vm0, %v1393_v38, 0.0  ;;  %v137_v49 = vsel %vm46_vm0, %v1330_v62, 0.0 }
  0x1b   :  { %970 = vmatprep.mubr.msk.f32.mxu1 %vm46_vm0, %v1299_v55  ;;  %996 = vmatprep.mubr.msk.f32.mxu0 %vm46_vm0, %v1304_v56  ;;  %v162_v55 = vmul.f32 %v1105_v9, %v1105_v9  ;;  %v166_v9 = vmul.f32 %v1158_v20, %v1158_v20 }
  0x1c   :  { %87 = vadd.xlane.f32.xlu1 %v86_v18  ;;  %v172_v18 = vmul.f32 %v1280_v50, %v1280_v50 }
  0x1d   :  { %84 = vadd.xlane.f32.xlu0 %v83_v19  ;;  %v196_v13 = vsel %vm46_vm0, %v166_v9, 0.0  ;;  %v171_v19 = vmul.f32 %v1304_v56, %v1304_v56 }
  0x1e   :  { %971 = vmatmul.mubr.msk.f32.gmra.mrb[12].mxu1 %vm46_vm0, %v1325_v61  ;;  %997 = vmatmul.mubr.msk.f32.gmra.mrb[12].mxu0 %vm46_vm0, %v1280_v50  ;;  %v178_v61 = vsel %vm46_vm0, %v160_v39, 0.0  ;;  %v214_v30 = vsel %vm46_vm0, %v172_v18, 0.0 }
  0x1f   :  { %973 = vmatprep.mubr.msk.f32.mxu1 %vm46_vm0, %v1330_v62  ;;  %999 = vmatprep.mubr.msk.f32.mxu0 %vm46_vm0, %v1393_v38  ;;  %v163_v62 = vmul.f32 %v1140_v15, %v1140_v15  ;;  %v168_v15 = vmul.f32 %v1198_v28, %v1198_v28  ;;  %v208_v28 = vsel %vm46_vm0, %v170_v12, 0.0  ;;  %v211_v31 = vsel %vm46_vm0, %v171_v19, 0.0 }
  0x20   :  { %93 = vadd.xlane.f32.xlu1 %v92_v42  ;;  %v174_v42 = vmul.f32 %v1372_v33, %v1372_v33 }
  0x21   :  { %90 = vadd.xlane.f32.xlu0 %v89_v43  ;;  %v187_v3 = vsel %vm46_vm0, %v163_v62, 0.0  ;;  %v202_v20 = vsel %vm46_vm0, %v168_v15, 0.0  ;;  %v173_v43 = vmul.f32 %v1393_v38, %v1393_v38 }
  0x22   :  { %974 = vmatmul.mubr.msk.f32.gmra.mrb[14].mxu1 %vm46_vm0, %v1335_v63  ;;  %1000 = vmatmul.mubr.msk.f32.gmra.mrb[14].mxu0 %vm46_vm0, %v1372_v33  ;;  %v184_v63 = vsel %vm46_vm0, %v162_v55, 0.0  ;;  %v220_v50 = vsel %vm46_vm0, %v174_v42, 0.0 }
  0x24   :  { %99 = vadd.xlane.f32.xlu1 %v98_v45  ;;  %v217_v45 = vsel %vm46_vm0, %v173_v43, 0.0 }
  0x25   :  { %96 = vadd.xlane.f32.xlu0 %v95_v46 }
  0x28   :  { %105 = vadd.xlane.f32.xlu1 %v104_v47 }
  0x29   :  { %102 = vadd.xlane.f32.xlu0 %v101_v48 }
  0x2c   :  { %111 = vadd.xlane.f32.xlu1 %v110_v7 }
  0x2d   :  { %108 = vadd.xlane.f32.xlu0 %v107_v53 }
  0x30   :  { %117 = vadd.xlane.f32.xlu1 %v116_v4 }
  0x31   :  { %114 = vadd.xlane.f32.xlu0 %v113_v54 }
  0x34   :  { %123 = vadd.xlane.f32.xlu1 %v122_v10 }
  0x35   :  { %120 = vadd.xlane.f32.xlu0 %v119_v14 }
  0x38   :  { %129 = vadd.xlane.f32.xlu1 %v128_v16 }
  0x39   :  { %126 = vadd.xlane.f32.xlu0 %v125_v21 }
  0x3c   :  { %135 = vadd.xlane.f32.xlu1 %v134_v23 }
  0x3d   :  { %132 = vadd.xlane.f32.xlu0 %v131_v27 }
  0x40   :  { %141 = vadd.xlane.f32.xlu1 %v140_v32 }
  0x41   :  { %138 = vadd.xlane.f32.xlu0 %v137_v49 }
  0x44   :  { %179 = vadd.xlane.f32.xlu1 %v178_v61 }
  0x45   :  { %176 = vadd.xlane.f32.xlu0 %v175_v2 }
  0x48   :  { %185 = vadd.xlane.f32.xlu1 %v184_v63 }
  0x49   :  { %182 = vadd.xlane.f32.xlu0 %v1182_v25  ;;  %v167_v25 = vmul.f32 %v1207_v29, %v1207_v29  ;;  %v205_v29 = vsel %vm46_vm0, %v169_v17, 0.0 }
  0x4b   :  { %v199_v22 = vsel %vm46_vm0, %v167_v25, 0.0 }
  0x4c   :  { %191 = vadd.xlane.f32.xlu1 %v190_v5 }
  0x4d   :  { %188 = vadd.xlane.f32.xlu0 %v187_v3 }
  0x50   :  { %197 = vadd.xlane.f32.xlu1 %v196_v13 }
  0x51   :  { %194 = vadd.xlane.f32.xlu0 %v193_v11 }
  0x54   :  { %203 = vadd.xlane.f32.xlu1 %v202_v20 }
  0x55   :  { %200 = vadd.xlane.f32.xlu0 %v199_v22 }
  0x58   :  { %209 = vadd.xlane.f32.xlu1 %v208_v28 }
  0x59   :  { %206 = vadd.xlane.f32.xlu0 %v205_v29 }
  0x5c   :  { %215 = vadd.xlane.f32.xlu1 %v214_v30 }
  0x5d   :  { %212 = vadd.xlane.f32.xlu0 %v211_v31 }
  0x60   :  { %221 = vadd.xlane.f32.xlu1 %v220_v50 }
  0x61   :  { %218 = vadd.xlane.f32.xlu0 %v217_v45 }
  0x64   :  { %243 = vadd.xlane.f32.xlu1 %v1250_v40 }
  0x65   :  { %240 = vadd.xlane.f32.xlu0 %v1253_v41 }
  0x68   :  { %249 = vadd.xlane.f32.xlu1 %v1283_v51 }
  0x69   :  { %246 = vadd.xlane.f32.xlu0 %v1286_v52 }
  0x6c   :  { %255 = vadd.xlane.f32.xlu1 %v1307_v57 }
  0x6d   :  { %252 = vadd.xlane.f32.xlu0 %v1310_v58 }
  0x70   :  { %261 = vadd.xlane.f32.xlu1 %v1313_v59 }
  0x71   :  { %258 = vadd.xlane.f32.xlu0 %v1316_v60 }
  0x74   :  { %267 = vadd.xlane.f32.xlu1 %v1338_v0 }
  0x75   :  { %264 = vadd.xlane.f32.xlu0 %v1341_v1 }
  0x78   :  { %273 = vadd.xlane.f32.xlu1 %v1360_v24 }
  0x79   :  { %270 = vadd.xlane.f32.xlu0 %v1363_v26 }
  0x7c   :  { %279 = vadd.xlane.f32.xlu1 %v1375_v34 }
  0x7d   :  { %276 = vadd.xlane.f32.xlu0 %v1378_v35 }
  0x80   :  { %285 = vadd.xlane.f32.xlu1 %v1381_v36 }
  0x81   :  { %282 = vadd.xlane.f32.xlu0 %v1384_v37 }
  0x91   :  { %v55_v40 = vpop.xlane.xlu1 %54 }
  0x92   :  { %v49_v41 = vpop.xlane.xlu0 %48 }
  0x95   :  { %v58_v51 = vpop.xlane.xlu1 %57 }
  0x96   :  { %v52_v52 = vpop.xlane.xlu0 %51 }
  0x99   :  { %v64_v56 = vpop.xlane.xlu1 %63 }
  0x9a   :  { %v61_v57 = vpop.xlane.xlu0 %60 }
  0x9d   :  { %v70_v58 = vpop.xlane.xlu1 %69 }
  0x9e   :  { %v1505_v59 = vpop.xlane.xlu0 %66 }
  0xa1   :  { %v1507_v60 = vpop.xlane.xlu1 %75 }
  0xa2   :  { %v1509_v0 = vpop.xlane.xlu0 %72 }
  0xa5   :  { %v1511_v1 = vpop.xlane.xlu1 %81 }
  0xa6   :  { %v1513_v24 = vpop.xlane.xlu0 %78 }
  0xa9   :  { %v1515_v26 = vpop.xlane.xlu1 %87 }
  0xaa   :  { %v1517_v33 = vpop.xlane.xlu0 %84 }
  0xad   :  { %v1519_v34 = vpop.xlane.xlu1 %93 }
  0xae   :  { %v1521_v35 = vpop.xlane.xlu0 %90 }
  0xb1   :  { %v100_v36 = vpop.xlane.xlu1 %99 }
  0xb2   :  { %v97_v37 = vpop.xlane.xlu0 %96  ;;  %v144_v39 = vadd.f32 %v100_v36, %v52_v52 }
  0xb3   :  { %v143_v44 = vadd.f32 %v97_v37, %v49_v41 }
  0xb4   :  { %v1541_v55 = vmul.f32 0.0625, %v144_v39 }
  0xb5   :  { %v106_v38 = vpop.xlane.xlu1 %105  ;;  %v1550_v5 = vmul.f32 0.0625, %v143_v44 }
  0xb6   :  { %v103_v46 = vpop.xlane.xlu0 %102  ;;  %v146_v2 = vadd.f32 %v106_v38, %v58_v51  ;;  %v1554_v13 = vmul.f32 %v1548_v8, %v1541_v55 }
  0xb7   :  { %v145_v62 = vadd.f32 %v103_v46, %v55_v40  ;;  %v1568_v28 = vmul.f32 %v1548_v8, %v1550_v5 }
  0xb8   :  { %v1556_v15 = vmul.f32 0.0625, %v146_v2 }
  0xb9   :  { %v112_v47 = vpop.xlane.xlu1 %111  ;;  %v1562_v12 = vmul.f32 0.0625, %v145_v62 }
  0xba   :  { %v109_v48 = vpop.xlane.xlu0 %108  ;;  %v148_v9 = vadd.f32 %v112_v47, %v64_v56  ;;  %v1578_v43 = vmul.f32 %v1548_v8, %v1556_v15 }
  0xbb   :  { %v147_v18 = vadd.f32 %v109_v48, %v61_v57  ;;  %v1588_v52 = vmul.f32 %v1548_v8, %v1562_v12 }
  0xbc   :  { %v1574_v30 = vmul.f32 0.0625, %v148_v9 }
  0xbd   :  { %v118_v7 = vpop.xlane.xlu1 %117  ;;  %v1592_v36 = vmul.f32 0.0625, %v147_v18 }
  0xbe   :  { %v115_v53 = vpop.xlane.xlu0 %114  ;;  %v150_v50 = vadd.f32 %v118_v7, %v70_v58  ;;  %v1601_v46 = vmul.f32 %v1548_v8, %v1574_v30 }
  0xbf   :  { %v149_v37 = vadd.f32 %v115_v53, %v1505_v59 }
  0xc0   :  { %v1603_v7 = vmul.f32 0.0625, %v150_v50 }
  0xc1   :  { %v124_v4 = vpop.xlane.xlu1 %123 }
  0xc2   :  { %v121_v54 = vpop.xlane.xlu0 %120  ;;  %v152_v39 = vadd.f32 %v124_v4, %v1507_v60 }
  0xc3   :  { %v151_v62 = vadd.f32 %v121_v54, %v1509_v0  ;;  %v1629_v0 = vmul.f32 %v1548_v8, %v1603_v7 }
  0xc4   :  { %v1631_v54 = vmul.f32 0.0625, %v152_v39 }
  0xc5   :  { %v1523_v10 = vpop.xlane.xlu1 %129  ;;  %1945 = vst [vmem:[#allocation2_spill] sm:$0xff] %v1629_v0 }
  0xc6   :  { %v1525_v14 = vpop.xlane.xlu0 %126 }
  0xc9   :  { %v1527_v16 = vpop.xlane.xlu1 %135 }
  0xca   :  { %v1529_v21 = vpop.xlane.xlu0 %132 }
  0xcd   :  { %v1531_v23 = vpop.xlane.xlu1 %141 }
  0xce   :  { %v1533_v27 = vpop.xlane.xlu0 %138 }
  0xd1   :  { %v1535_v32 = vpop.xlane.xlu1 %179 }
  0xd2   :  { %v1537_v49 = vpop.xlane.xlu0 %176 }
  0xd5   :  { %v1539_v61 = vpop.xlane.xlu1 %185 }
  0xd6   :  { %v1543_v63 = vpop.xlane.xlu0 %182 }
  0xd9   :  { %v954_v3 = vpop.f32.mrb[0].mxu1  ;;  %v980_v6 = vpop.f32.mrb[0].mxu0 }
  0xda   :  { %v1558_v11 = vadd.f32 %v980_v6, %v954_v3  ;;  %v1560_v25 = vpop.xlane.xlu1 %191  ;;  %v515_v20 = vpop.f32.mrb[1].mxu1  ;;  %v1617_v6 = vmul.f32 %v1548_v8, %v1592_v36 }
  0xdb   :  { %v708_v22 = vpop.f32.mrb[1].mxu0  ;;  %v1564_v17 = vpop.xlane.xlu0 %188 }
  0xdc   :  { %v1572_v19 = vadd.f32 %v708_v22, %v515_v20  ;;  %v1619_v20 = vmul.f32 0.0625, %v149_v37  ;;  %v154_v22 = vadd.f32 %v1523_v10, %v1511_v1  ;;  %v1639_v37 = vmul.f32 0.0625, %v151_v62 }
  0xdd   :  { %v957_v42 = vpop.f32.mrb[2].mxu1  ;;  %v983_v31 = vpop.f32.mrb[2].mxu0 }
  0xde   :  { %v1582_v40 = vadd.f32 %v983_v31, %v957_v42  ;;  %v1584_v41 = vpop.xlane.xlu1 %197  ;;  %v525_v51 = vpop.f32.mrb[3].mxu1  ;;  %v1645_v10 = vmul.f32 %v1548_v8, %v1619_v20  ;;  %v156_v31 = vadd.f32 %v1527_v16, %v1515_v26  ;;  %v155_v26 = vadd.f32 %v1529_v21, %v1517_v33 }
  0xdf   :  { %v718_v56 = vpop.f32.mrb[3].mxu0  ;;  %v1590_v57 = vpop.xlane.xlu0 %194 }
  0xe0   :  { %v1597_v38 = vadd.f32 %v718_v56, %v525_v51  ;;  %1946 = vst [vmem:[#allocation3_spill] sm:$0xff] %v1645_v10  ;;  %v1685_v45 = vmul.f32 0.0625, %v156_v31 }
  0xe1   :  { %v960_v47 = vpop.f32.mrb[4].mxu1  ;;  %v986_v48 = vpop.f32.mrb[4].mxu0 }
  0xe2   :  { %v1608_v2 = vadd.f32 %v986_v48, %v960_v47  ;;  %v1610_v59 = vpop.xlane.xlu1 %203  ;;  %v535_v53 = vpop.f32.mrb[5].mxu1  ;;  %v153_v48 = vadd.f32 %v1525_v14, %v1513_v24  ;;  %v1711_v29 = vmul.f32 %v1548_v8, %v1685_v45 }
  0xe3   :  { %v728_v9 = vpop.f32.mrb[5].mxu0  ;;  %v1613_v3 = vpop.xlane.xlu0 %200 }
  0xe4   :  { %v1623_v4 = vadd.f32 %v728_v9, %v535_v53  ;;  %v1653_v9 = vmul.f32 0.0625, %v154_v22  ;;  %v1669_v22 = vmul.f32 %v1548_v8, %v1639_v37  ;;  %v1673_v44 = vmul.f32 0.0625, %v153_v48  ;;  %1956 = vst [vmem:[#allocation13_spill] sm:$0xff] %v1711_v29 }
  0xe5   :  { %v963_v18 = vpop.f32.mrb[6].mxu1  ;;  %v989_v42 = vpop.f32.mrb[6].mxu0  ;;  %v158_v48 = vadd.f32 %v1531_v23, %v1519_v34 }
  0xe6   :  { %v1635_v50 = vadd.f32 %v989_v42, %v963_v18  ;;  %v1637_v51 = vpop.xlane.xlu1 %209  ;;  %v545_v56 = vpop.f32.mrb[7].mxu1  ;;  %v1657_v42 = vmul.f32 %v1548_v8, %v1631_v54  ;;  %1950 = vst [vmem:[#allocation7_spill] sm:$0xff] %v1669_v22  ;;  %v1701_v31 = vmul.f32 %v1548_v8, %v1673_v44 }
  0xe7   :  { %v738_v47 = vpop.f32.mrb[7].mxu0  ;;  %v1641_v1 = vpop.xlane.xlu0 %206 }
  0xe8   :  { %v1651_v53 = vadd.f32 %v738_v47, %v545_v56  ;;  %1948 = vst [vmem:[#allocation5_spill] sm:$0xff] %v1657_v42  ;;  %1954 = vst [vmem:[#allocation11_spill] sm:$0xff] %v1701_v31 }
  0xe9   :  { %v966_v18 = vpop.f32.mrb[8].mxu1  ;;  %v992_v62 = vpop.f32.mrb[8].mxu0 }
  0xea   :  { %1947 = vst [vmem:[#allocation4_spill] sm:$0xff] %v1651_v53  ;;  %v1663_v24 = vadd.f32 %v992_v62, %v966_v18  ;;  %v1665_v14 = vpop.xlane.xlu1 %215  ;;  %v555_v56 = vpop.f32.mrb[9].mxu1  ;;  %v1683_v62 = vmul.f32 %v1548_v8, %v1653_v9 }
  0xeb   :  { %v748_v47 = vpop.f32.mrb[9].mxu0  ;;  %v1671_v39 = vpop.xlane.xlu0 %212 }
  0xec   :  { %1949 = vst [vmem:[#allocation6_spill] sm:$0xff] %v1663_v24  ;;  %v1679_v18 = vadd.f32 %v748_v47, %v555_v56  ;;  %1952 = vst [vmem:[#allocation9_spill] sm:$0xff] %v1683_v62  ;;  %v157_v47 = vadd.f32 %v1533_v27, %v1521_v35  ;;  %v1703_v24 = vmul.f32 0.0625, %v155_v26  ;;  %v1713_v35 = vmul.f32 0.0625, %v158_v48 }
  0xed   :  { %v969_v60 = vpop.f32.mrb[10].mxu1  ;;  %v995_v58 = vpop.f32.mrb[10].mxu0 }
  0xee   :  { %1951 = vst [vmem:[#allocation8_spill] sm:$0xff] %v1679_v18  ;;  %v1691_v33 = vadd.f32 %v995_v58, %v969_v60  ;;  %v1693_v21 = vpop.xlane.xlu1 %221  ;;  %v565_v56 = vpop.f32.mrb[11].mxu1  ;;  %v1719_v10 = vmul.f32 0.0625, %v157_v47  ;;  %v1724_v62 = vmul.f32 %v1548_v8, %v1703_v24  ;;  %v335_v47 = vmul.f32 %v1550_v5, %v1550_v5 }
  0xef   :  { %v758_v16 = vpop.f32.mrb[11].mxu0  ;;  %v1697_v42 = vpop.xlane.xlu0 %218  ;;  %v1737_v31 = vmul.f32 %v1548_v8, %v1713_v35 }
  0xf0   :  { %1953 = vst [vmem:[#allocation10_spill] sm:$0xff] %v1691_v33  ;;  %v1707_v23 = vadd.f32 %v758_v16, %v565_v56 }
  0xf1   :  { %v972_v58 = vpop.f32.mrb[12].mxu1  ;;  %v998_v60 = vpop.f32.mrb[12].mxu0 }
  0xf2   :  { %1955 = vst [vmem:[#allocation12_spill] sm:$0xff] %v1707_v23  ;;  %v1717_v22 = vadd.f32 %v998_v60, %v972_v58  ;;  %v244_v26 = vpop.xlane.xlu1 %243  ;;  %v575_v18 = vpop.f32.mrb[13].mxu1  ;;  %v336_v60 = vmul.f32 %v1541_v55, %v1541_v55  ;;  %v1745_v55 = vmul.f32 %v1548_v8, %v1719_v10  ;;  %v337_v8 = vmul.f32 %v1562_v12, %v1562_v12 }
  0xf3   :  { %v288_v16 = vadd.f32 %v244_v26, %v1535_v32  ;;  %v768_v56 = vpop.f32.mrb[13].mxu0  ;;  %v241_v34 = vpop.xlane.xlu0 %240 }
  0xf4   :  { %1957 = vst [vmem:[#allocation14_spill] sm:$0xff] %v1717_v22  ;;  %v1728_v33 = vadd.f32 %v768_v56, %v575_v18  ;;  %v287_v58 = vadd.f32 %v241_v34, %v1537_v49 }
  0xf5   :  { %v320_v32 = vmul.f32 0.0625, %v288_v16  ;;  %v975_v26 = vpop.f32.mrb[14].mxu1  ;;  %v1001_v27 = vpop.f32.mrb[14].mxu0 }
  0xf6   :  { %v319_v18 = vmul.f32 0.0625, %v287_v58  ;;  %v1741_v56 = vadd.f32 %v1001_v27, %v975_v26  ;;  %v250_v49 = vpop.xlane.xlu1 %249  ;;  %v585_v34 = vpop.f32.mrb[15].mxu1  ;;  %v338_v58 = vmul.f32 %v1556_v15, %v1556_v15 }
  0xf7   :  { %v352_v5 = vsub.f32 %v320_v32, %v336_v60  ;;  %v290_v16 = vadd.f32 %v250_v49, %v1539_v61  ;;  %v778_v29 = vpop.f32.mrb[15].mxu0  ;;  %v247_v22 = vpop.xlane.xlu0 %246 }
  0xf8   :  { %v351_v23 = vsub.f32 %v319_v18, %v335_v47  ;;  %v824_v53 = vsub.f32 %v1741_v56, %v1737_v31  ;;  %v1750_v0 = vadd.f32 %v778_v29, %v585_v34  ;;  %v289_v27 = vadd.f32 %v247_v22, %v1543_v63 }
  0xf9   :  { %v368_v26 = vadd.f32 1e-05, %v352_v5  ;;  %v322_v48 = vmul.f32 0.0625, %v290_v16  ;;  %v340_v22 = vmul.f32 %v1574_v30, %v1574_v30  ;;  %v342_v30 = vmul.f32 %v1603_v7, %v1603_v7  ;;  %v1776_v7 = vld [vmem:[%s1930_s2 + $0x1] ss:$0 sm:$0xff] }
  0xfa   :  { %v367_v60 = vadd.f32 1e-05, %v351_v23  ;;  %v823_v61 = vsub.f32 %v1750_v0, %v1745_v55  ;;  %v321_v47 = vmul.f32 0.0625, %v289_v27  ;;  %v256_v32 = vpop.xlane.xlu1 %255  ;;  %v339_v23 = vmul.f32 %v1592_v36, %v1592_v36 }
  0xfb   :  { %1018 = vrsqrt.f32 %v368_v26  ;;  %v354_v18 = vsub.f32 %v322_v48, %v338_v58  ;;  %v292_v29 = vadd.f32 %v256_v32, %v1560_v25  ;;  %v253_v49 = vpop.xlane.xlu0 %252  ;;  %v341_v36 = vmul.f32 %v1619_v20, %v1619_v20 }
  0xfc   :  { %1020 = vrsqrt.f32 %v367_v60  ;;  %v353_v63 = vsub.f32 %v321_v47, %v337_v8  ;;  %v291_v15 = vadd.f32 %v253_v49, %v1564_v17  ;;  %v344_v20 = vmul.f32 %v1631_v54, %v1631_v54 }
  0xfd   :  { %v370_v34 = vadd.f32 1e-05, %v354_v18  ;;  %v324_v12 = vmul.f32 0.0625, %v292_v29 }
  0xfe   :  { %v369_v5 = vadd.f32 1e-05, %v353_v63  ;;  %v323_v16 = vmul.f32 0.0625, %v291_v15  ;;  %v262_v27 = vpop.xlane.xlu1 %261 }
  0xff   :  { %1022 = vrsqrt.f32 %v370_v34  ;;  %v356_v48 = vsub.f32 %v324_v12, %v340_v22  ;;  %v294_v25 = vadd.f32 %v262_v27, %v1584_v41  ;;  %v259_v58 = vpop.xlane.xlu0 %258 }
 0x100   :  { %1024 = vrsqrt.f32 %v369_v5  ;;  %v355_v26 = vsub.f32 %v323_v16, %v339_v23  ;;  %v293_v17 = vadd.f32 %v259_v58, %v1590_v57  ;;  %v1958_v23 = vsub.f32 %v1558_v11, %v1554_v13 }
 0x101   :  { %v372_v8 = vadd.f32 1e-05, %v356_v48  ;;  %v326_v60 = vmul.f32 0.0625, %v294_v25  ;;  %v1959_v48 = vsub.f32 %v1572_v19, %v1568_v28  ;;  %v346_v11 = vmul.f32 %v1653_v9, %v1653_v9 }
 0x102   :  { %v371_v47 = vadd.f32 1e-05, %v355_v26  ;;  %v325_v32 = vmul.f32 0.0625, %v293_v17  ;;  %v268_v18 = vpop.xlane.xlu1 %267 }
 0x103   :  { %1026 = vrsqrt.f32 %v372_v8  ;;  %v358_v29 = vsub.f32 %v326_v60, %v342_v30  ;;  %v296_v41 = vadd.f32 %v268_v18, %v1610_v59  ;;  %v265_v49 = vpop.xlane.xlu0 %264  ;;  %v343_v59 = vmul.f32 %v1639_v37, %v1639_v37 }
 0x104   :  { %1028 = vrsqrt.f32 %v371_v47  ;;  %v357_v63 = vsub.f32 %v325_v32, %v341_v36  ;;  %v295_v57 = vadd.f32 %v265_v49, %v1613_v3  ;;  %v345_v36 = vmul.f32 %v1673_v44, %v1673_v44 }
 0x105   :  { %v1019_v15 = vpop.eup %1018  ;;  %v374_v22 = vadd.f32 1e-05, %v358_v29  ;;  %v328_v34 = vmul.f32 0.0625, %v296_v41  ;;  %v1961_v44 = vsub.f32 %v1597_v38, %v1588_v52 }
 0x106   :  { %v1021_v12 = vpop.eup %1020  ;;  %v826_v3 = vmul.f32 %v1019_v15, %v1958_v23  ;;  %v373_v5 = vadd.f32 1e-05, %v357_v63  ;;  %v327_v16 = vmul.f32 0.0625, %v295_v57  ;;  %v274_v27 = vpop.xlane.xlu1 %273  ;;  %v348_v15 = vmul.f32 %v1685_v45, %v1685_v45 }
 0x107   :  { %v825_v25 = vmul.f32 %v1021_v12, %v1959_v48  ;;  %1030 = vrsqrt.f32 %v374_v22  ;;  %v360_v54 = vsub.f32 %v328_v34, %v344_v20  ;;  %v298_v58 = vadd.f32 %v274_v27, %v1637_v51  ;;  %v271_v26 = vpop.xlane.xlu0 %270 }
 0x108   :  { %v846_v17 = vadd.f32 %v1776_v7, %v826_v3  ;;  %1032 = vrsqrt.f32 %v373_v5  ;;  %v359_v37 = vsub.f32 %v327_v16, %v343_v59  ;;  %v297_v30 = vadd.f32 %v271_v26, %v1641_v1 }
 0x109   :  { %v1023_v13 = vpop.eup %1022  ;;  %v845_v8 = vadd.f32 %v1776_v7, %v825_v25  ;;  %v376_v60 = vadd.f32 1e-05, %v360_v54  ;;  %v330_v28 = vmul.f32 0.0625, %v298_v58  ;;  %v1960_v51 = vsub.f32 %v1582_v40, %v1578_v43 }
 0x10a   :  { %v1025_v19 = vpop.eup %1024  ;;  %863 = vst.msk [vmem:[%s1931_s3 + $0x8] sm:$0xff] %vm861_vm1, %v846_v17  ;;  %v375_v47 = vadd.f32 1e-05, %v359_v37  ;;  %v329_v32 = vmul.f32 0.0625, %v297_v30  ;;  %v280_v9 = vpop.xlane.xlu1 %279  ;;  %v347_v34 = vmul.f32 %v1703_v24, %v1703_v24  ;;  %v1963_v24 = vsub.f32 %v1623_v4, %v1617_v6 }
 0x10b   :  { %v828_v1 = vmul.f32 %v1023_v13, %v1960_v51  ;;  %862 = vst.msk [vmem:[%s1931_s3] sm:$0xff] %vm861_vm1, %v845_v8  ;;  %v827_v18 = vmul.f32 %v1025_v19, %v1961_v44  ;;  %1034 = vrsqrt.f32 %v376_v60  ;;  %v362_v29 = vsub.f32 %v330_v28, %v346_v11  ;;  %v277_v49 = vpop.xlane.xlu0 %276  ;;  %v1967_v13 = vld [vmem:[#allocation3_spill] sm:$0xff] }
 0x10c   :  { %v300_v41 = vadd.f32 %v280_v9, %v1665_v14  ;;  %1036 = vrsqrt.f32 %v375_v47  ;;  %v361_v40 = vsub.f32 %v329_v32, %v345_v36  ;;  %v299_v63 = vadd.f32 %v277_v49, %v1671_v39  ;;  %v1970_v47 = vld [vmem:[#allocation5_spill] sm:$0xff] }
 0x10d   :  { %v848_v43 = vadd.f32 %v1776_v7, %v828_v1  ;;  %v1027_v57 = vpop.eup %1026  ;;  %v847_v20 = vadd.f32 %v1776_v7, %v827_v18  ;;  %v378_v22 = vadd.f32 1e-05, %v362_v29  ;;  %v1962_v39 = vsub.f32 %v1608_v2, %v1601_v46  ;;  %v1969_v1 = vld [vmem:[#allocation6_spill] sm:$0xff]  ;;  %v1972_v18 = vld [vmem:[#allocation8_spill] sm:$0xff]  ;;  %v1973_v29 = vld [vmem:[#allocation7_spill] sm:$0xff] }
 0x10e   :  { %v332_v52 = vmul.f32 0.0625, %v300_v41  ;;  %v1029_v38 = vpop.eup %1028  ;;  %v377_v12 = vadd.f32 1e-05, %v361_v40  ;;  %v331_v59 = vmul.f32 0.0625, %v299_v63  ;;  %v286_v45 = vpop.xlane.xlu1 %285  ;;  %v350_v25 = vmul.f32 %v1713_v35, %v1713_v35  ;;  %v1966_v35 = vld [vmem:[#allocation4_spill] sm:$0xff] }
 0x10f   :  { %865 = vst.msk [vmem:[%s1931_s3 + $0x18] sm:$0xff] %vm861_vm1, %v848_v43  ;;  %v830_v14 = vmul.f32 %v1027_v57, %v1962_v39  ;;  %864 = vst.msk [vmem:[%s1931_s3 + $0x10] sm:$0xff] %vm861_vm1, %v847_v20  ;;  %v829_v23 = vmul.f32 %v1029_v38, %v1963_v24  ;;  %1038 = vrsqrt.f32 %v378_v22  ;;  %v302_v5 = vadd.f32 %v286_v45, %v1693_v21  ;;  %v283_v16 = vpop.xlane.xlu0 %282  ;;  %v1964_v21 = vld [vmem:[#allocation2_spill] sm:$0xff]  ;;  %v1976_v20 = vld [vmem:[#allocation9_spill] sm:$0xff] }
 0x110   :  { %v364_v3 = vsub.f32 %v332_v52, %v348_v15  ;;  %1040 = vrsqrt.f32 %v377_v12  ;;  %v363_v2 = vsub.f32 %v331_v59, %v347_v34  ;;  %v301_v27 = vadd.f32 %v283_v16, %v1697_v42  ;;  %v1975_v15 = vld [vmem:[#allocation10_spill] sm:$0xff]  ;;  %v1978_v38 = vld [vmem:[#allocation12_spill] sm:$0xff]  ;;  %v1979_v34 = vld [vmem:[#allocation11_spill] sm:$0xff] }
 0x111   :  { %v850_v46 = vadd.f32 %v1776_v7, %v830_v14  ;;  %v1031_v48 = vpop.eup %1030  ;;  %v849_v54 = vadd.f32 %v1776_v7, %v829_v23  ;;  %v334_v6 = vmul.f32 0.0625, %v302_v5  ;;  %v349_v26 = vmul.f32 %v1719_v10, %v1719_v10  ;;  %v1981_v23 = vld [vmem:[#allocation14_spill] sm:$0xff] }
 0x112   :  { %v380_v58 = vadd.f32 1e-05, %v364_v3  ;;  %v1033_v4 = vpop.eup %1032  ;;  %v1965_v42 = vsub.f32 %v1635_v50, %v1964_v21  ;;  %v379_v37 = vadd.f32 1e-05, %v363_v2  ;;  %v333_v30 = vmul.f32 0.0625, %v301_v27  ;;  %v1982_v3 = vld [vmem:[#allocation13_spill] sm:$0xff] }
 0x113   :  { %867 = vst.msk [vmem:[%s1931_s3 + $0x28] sm:$0xff] %vm861_vm1, %v850_v46  ;;  %866 = vst.msk [vmem:[%s1931_s3 + $0x20] sm:$0xff] %vm861_vm1, %v849_v54  ;;  %v1968_v11 = vsub.f32 %v1966_v35, %v1967_v13  ;;  %v366_v8 = vsub.f32 %v334_v6, %v350_v25  ;;  %v1971_v32 = vsub.f32 %v1969_v1, %v1970_v47 }
 0x114   :  { %v832_v17 = vmul.f32 %v1031_v48, %v1965_v42  ;;  %1042 = vrsqrt.f32 %v380_v58  ;;  %v365_v28 = vsub.f32 %v333_v30, %v349_v26  ;;  %v1974_v41 = vsub.f32 %v1972_v18, %v1973_v29 }
 0x115   :  { %v831_v10 = vmul.f32 %v1033_v4, %v1968_v11  ;;  %1044 = vrsqrt.f32 %v379_v37  ;;  %v1035_v19 = vpop.eup %1034  ;;  %v382_v36 = vadd.f32 1e-05, %v366_v8  ;;  %v1977_v22 = vsub.f32 %v1975_v15, %v1976_v20 }
 0x116   :  { %v852_v60 = vadd.f32 %v1776_v7, %v832_v17  ;;  %v1037_v51 = vpop.eup %1036  ;;  %v834_v9 = vmul.f32 %v1035_v19, %v1971_v32  ;;  %v381_v44 = vadd.f32 1e-05, %v365_v28  ;;  %v1980_v39 = vsub.f32 %v1978_v38, %v1979_v34 }
 0x117   :  { %v851_v50 = vadd.f32 %v1776_v7, %v831_v10  ;;  %v833_v49 = vmul.f32 %v1037_v51, %v1974_v41  ;;  %1046 = vrsqrt.f32 %v382_v36  ;;  %v1983_v5 = vsub.f32 %v1981_v23, %v1982_v3 }
 0x118   :  { %869 = vst.msk [vmem:[%s1931_s3 + $0x38] sm:$0xff] %vm861_vm1, %v852_v60  ;;  %v854_v43 = vadd.f32 %v1776_v7, %v834_v9  ;;  %1048 = vrsqrt.f32 %v381_v44  ;;  %v1984_v46 = vsub.f32 %v1728_v33, %v1724_v62 }
 0x119   :  { %868 = vst.msk [vmem:[%s1931_s3 + $0x30] sm:$0xff] %vm861_vm1, %v851_v50  ;;  %v1039_v40 = vpop.eup %1038  ;;  %v853_v63 = vadd.f32 %v1776_v7, %v833_v49 }
 0x11a   :  { %v1041_v57 = vpop.eup %1040  ;;  %871 = vst.msk [vmem:[%s1931_s3 + $0x48] sm:$0xff] %vm861_vm1, %v854_v43  ;;  %v836_v52 = vmul.f32 %v1039_v40, %v1977_v22 }
 0x11b   :  { %870 = vst.msk [vmem:[%s1931_s3 + $0x40] sm:$0xff] %vm861_vm1, %v853_v63  ;;  %v835_v14 = vmul.f32 %v1041_v57, %v1980_v39 }
 0x11c   :  { %v856_v12 = vadd.f32 %v1776_v7, %v836_v52 }
 0x11d   :  { %v855_v45 = vadd.f32 %v1776_v7, %v835_v14 }
 0x11e   :  { %v1043_v59 = vpop.eup %1042  ;;  %873 = vst.msk [vmem:[%s1931_s3 + $0x58] sm:$0xff] %vm861_vm1, %v856_v12 }
 0x11f   :  { %v1045_v24 = vpop.eup %1044  ;;  %v838_v16 = vmul.f32 %v1043_v59, %v1983_v5  ;;  %872 = vst.msk [vmem:[%s1931_s3 + $0x50] sm:$0xff] %vm861_vm1, %v855_v45 }
 0x120   :  { %v837_v2 = vmul.f32 %v1045_v24, %v1984_v46 }
 0x121   :  { %v858_v27 = vadd.f32 %v1776_v7, %v838_v16  ;;  %v1047_v48 = vpop.eup %1046 }
 0x122   :  { %v857_v25 = vadd.f32 %v1776_v7, %v837_v2  ;;  %v1049_v54 = vpop.eup %1048  ;;  %v840_v58 = vmul.f32 %v1047_v48, %v824_v53 }
 0x123   :  { %875 = vst.msk [vmem:[%s1931_s3 + $0x68] sm:$0xff] %vm861_vm1, %v858_v27  ;;  %v839_v62 = vmul.f32 %v1049_v54, %v823_v61 }
 0x124   :  { %874 = vst.msk [vmem:[%s1931_s3 + $0x60] sm:$0xff] %vm861_vm1, %v857_v25  ;;  %v860_v33 = vadd.f32 %v1776_v7, %v840_v58 }
 0x125   :  { %v859_v6 = vadd.f32 %v1776_v7, %v839_v62 }
 0x126   :  { %877 = vst.msk [vmem:[%s1931_s3 + $0x78] sm:$0xff] %vm861_vm1, %v860_v33 }
 0x127   :  { %876 = vst.msk [vmem:[%s1931_s3 + $0x70] sm:$0xff] %vm861_vm1, %v859_v6 }

</bundles_post_ra>
